<compile_context>
chip_gen: v6e
topology: v6e:2x2x1
jax: 0.10.0
libtpu: 0.0.40
codegen_flags: <defaults>
</compile_context>

<pallas_src>
import math

import jax
import jax.numpy as jnp
from jax.experimental import pallas as pl
from jax.experimental.pallas import tpu as pltpu


def _round_up(n, m):
    return (n + m - 1) // m * m


def _timestamp_encoding_kernel(x_ref, smat_ref, offset_ref, linmask_ref, o_ref):
    # x_ref:       (TM, k)      packed timestamps (k tokens per output row)
    # smat_ref:    (k, width)   block-diagonal fused scale (w | f | f per slot)
    # offset_ref:  (1, width)   fused offset (b | p | p + pi/2 per slot)
    # linmask_ref: (1, width)   int32: 1 = linear lane, 0 = trig lane
    # o_ref:       (TM, width)  lane-dense output block
    arg = jnp.dot(x_ref[...], smat_ref[...],
                  preferred_element_type=jnp.float32) + offset_ref[...]
    trig = jnp.sin(arg)  # cos lanes already carry the +pi/2 phase fold
    o_ref[...] = jnp.where(linmask_ref[...] != 0, arg, trig)


def timestamp_encoding(x, weight, bias, frequencies, phase_shifts, *, tm=2048):
    """x: (B, S) timestamps. Returns (B, S, d_model) float32."""
    B, S = x.shape
    d_half = weight.shape[0]          # weight: (d_model//2, 1)
    d_quarter = frequencies.shape[0]  # (d_model//4,)
    d_out = d_half + 2 * d_quarter    # == d_model

    # Lane packing factor: pack k tokens so width = k*d_out is a multiple of
    # 128 (lane-dense stores) for any d_out.  Cap width to keep tiles sane.
    k = 128 // math.gcd(d_out, 128)
    if k * d_out > 4096:
        k = 1
    width = k * d_out

    N = B * S
    Nr = pl.cdiv(N, k)                 # packed rows needed
    Nr8 = _round_up(max(Nr, 1), 8)     # minimal (sublane) padding only

    # Row tile: big enough to amortize per-step overhead, capped to ~2 MiB
    # output blocks (v7x-friendly VMEM footprint).
    tm_cap = max(8, ((2 * 1024 * 1024) // (4 * width)) // 8 * 8)
    tm_eff = min(max(8, _round_up(tm, 8)), tm_cap, Nr8)
    # Ensure >= 2 grid steps when rows allow it (megacore on v7x).
    if Nr8 >= 16:
        tm_eff = min(tm_eff, _round_up(pl.cdiv(Nr8, 2), 8))

    # Pack timestamps: (Nr8, k) rows of k consecutive tokens.
    xf = x.reshape(N).astype(jnp.float32)
    if Nr8 * k != N:
        xf = jnp.pad(xf, (0, Nr8 * k - N))
    x2 = xf.reshape(Nr8, k)

    w = weight.reshape(d_half).astype(jnp.float32)
    b = bias.reshape(d_half).astype(jnp.float32)
    f = frequencies.reshape(d_quarter).astype(jnp.float32)
    p = phase_shifts.reshape(d_quarter).astype(jnp.float32)

    half_pi = jnp.float32(0.5 * jnp.pi)
    scale_row = jnp.concatenate([w, f, f])                     # (d_out,)
    offset_row = jnp.concatenate([b, p, p + half_pi])          # cos -> sin fold
    lin_row = jnp.concatenate([
        jnp.ones((d_half,), jnp.int32),
        jnp.zeros((2 * d_quarter,), jnp.int32),
    ])

    scale = jnp.tile(scale_row, k)                             # (width,)
    offset = jnp.tile(offset_row, k).reshape(1, width)
    linmask = jnp.tile(lin_row, k).reshape(1, width)

    # Block-diagonal scale matrix S (k, width): token slot i owns lanes
    # [i*d_out, (i+1)*d_out); the MXU matmul does the broadcast + multiply.
    slot = jnp.arange(width, dtype=jnp.int32) // d_out         # (width,)
    smat = (slot[None, :] == jnp.arange(k, dtype=jnp.int32)[:, None]
            ).astype(jnp.float32) * scale[None, :]             # (k, width)

    grid = (pl.cdiv(Nr8, tm_eff),)
    out = pl.pallas_call(
        _timestamp_encoding_kernel,
        out_shape=jax.ShapeDtypeStruct((Nr8, width), jnp.float32),
        grid_spec=pltpu.PrefetchScalarGridSpec(
            num_scalar_prefetch=0,
            grid=grid,
            in_specs=[
                pl.BlockSpec((tm_eff, k), lambda i: (i, 0)),    # packed timestamps
                pl.BlockSpec((k, width), lambda i: (0, 0)),     # scale matrix
                pl.BlockSpec((1, width), lambda i: (0, 0)),     # fused offset
                pl.BlockSpec((1, width), lambda i: (0, 0)),     # linear-lane mask
            ],
            out_specs=pl.BlockSpec((tm_eff, width), lambda i: (i, 0)),
        ),
        compiler_params=pltpu.CompilerParams(
            dimension_semantics=("parallel",),
            vmem_limit_bytes=32 * 1024 * 1024,
        ),
        cost_estimate=pl.CostEstimate(
            flops=2 * Nr8 * k * width + Nr8 * width,
            transcendentals=Nr8 * width // 2,
            bytes_accessed=4 * (Nr8 * k + Nr8 * width + (k + 2) * width),
        ),
    )(x2, smat, offset, linmask)

    out = out.reshape(Nr8 * k, d_out)
    if Nr8 * k != N:
        out = out[:N]
    return out.reshape(B, S, d_out)


def timestamp_encoding_ref(x, weight, bias, frequencies, phase_shifts):
    """Pure-JAX reference matching the PyTorch forward."""
    x = x[..., None].astype(jnp.float32)                         # (B, S, 1)
    linear_part = x * weight.reshape(-1) + bias                  # (B, S, d/2)
    arg = x * frequencies + phase_shifts                         # (B, S, d/4)
    return jnp.concatenate([linear_part, jnp.sin(arg), jnp.cos(arg)], axis=-1)


if __name__ == "__main__":
    # Small, deterministic setup: batch=2, seq=8, d_model=32.
    B, S, d_model = 2, 8, 32
    d_half, d_quarter = d_model // 2, d_model // 4

    key = jax.random.PRNGKey(0)
    kx, kw, kb, kf, kp, kx2 = jax.random.split(key, 6)

    # Deterministic parameter init (shapes match the PyTorch module).
    weight = jax.random.normal(kw, (d_half, 1), jnp.float32) * 0.5   # Linear(1, d/2).weight
    bias = jax.random.normal(kb, (d_half,), jnp.float32) * 0.1       # Linear(1, d/2).bias
    frequencies = jax.random.uniform(kf, (d_quarter,), jnp.float32) * 10.0
    phase_shifts = jax.random.uniform(kp, (d_quarter,), jnp.float32) * 2.0 * jnp.pi

    # Moderate timestamps so f32 sin range reduction is exact within tolerance.
    x = jax.random.uniform(kx, (B, S), jnp.float32) * 10.0

    out = timestamp_encoding(x, weight, bias, frequencies, phase_shifts)
    out = jax.block_until_ready(out)
    ref = timestamp_encoding_ref(x, weight, bias, frequencies, phase_shifts)
    assert out.shape == (B, S, d_model)
    assert jnp.allclose(out, ref, atol=1e-4, rtol=1e-4), (
        "mismatch vs reference, max abs diff = "
        f"{float(jnp.max(jnp.abs(out - ref)))}")

    # Second check exercising the ragged/multi-step grid and de-pad path.
    B2, S2 = 3, 13
    x_odd = jax.random.uniform(kx2, (B2, S2), jnp.float32) * 10.0
    out2 = timestamp_encoding(x_odd, weight, bias, frequencies, phase_shifts)
    out2 = jax.block_until_ready(out2)
    ref2 = timestamp_encoding_ref(x_odd, weight, bias, frequencies, phase_shifts)
    assert out2.shape == (B2, S2, d_model)
    assert jnp.allclose(out2, ref2, atol=1e-4, rtol=1e-4), (
        "mismatch vs reference (ragged case), max abs diff = "
        f"{float(jnp.max(jnp.abs(out2 - ref2)))}")

    print("KERNEL_OK")
</pallas_src>

<mosaic_0001>
module attributes {stable_mosaic.version = 11 : i64} {
  func.func @_timestamp_encoding_kernel(%arg0: i32, %arg1: memref<8x4xf32, #tpu.memory_space<vmem>>, %arg2: memref<4x128xf32, #tpu.memory_space<vmem>>, %arg3: memref<1x128xf32, #tpu.memory_space<vmem>>, %arg4: memref<1x128xi32, #tpu.memory_space<vmem>>, %arg5: memref<8x128xf32, #tpu.memory_space<vmem>>) attributes {dimension_semantics = [#tpu.dimension_semantics<parallel>], iteration_bounds = array<i64: 1>, scalar_prefetch = 0 : i64, scratch_operands = 0 : i64, tpu.core_type = #tpu.core_type<tc>, window_params = [{transform_indices = @transform_0, window_bounds = array<i64: 8, 4>}, {pipeline_mode = #tpu.pipeline_mode<synchronous>, transform_indices = @transform_1, window_bounds = array<i64: 4, 128>}, {pipeline_mode = #tpu.pipeline_mode<synchronous>, transform_indices = @transform_2, window_bounds = array<i64: 1, 128>}, {pipeline_mode = #tpu.pipeline_mode<synchronous>, transform_indices = @transform_3, window_bounds = array<i64: 1, 128>}, {transform_indices = @transform_4, window_bounds = array<i64: 8, 128>}]} {
    %c0 = arith.constant 0 : index
    %c0_0 = arith.constant 0 : index
    %0 = vector.load %arg1[%c0, %c0_0] : memref<8x4xf32, #tpu.memory_space<vmem>>, vector<8x4xf32>
    %c0_1 = arith.constant 0 : index
    %c0_2 = arith.constant 0 : index
    %1 = vector.load %arg2[%c0_1, %c0_2] : memref<4x128xf32, #tpu.memory_space<vmem>>, vector<4x128xf32>
    %cst = arith.constant dense<0.000000e+00> : vector<8x128xf32>
    %2 = tpu.matmul %0, %1, %cst {dimension_numbers = #tpu.dot_dimension_numbers<[1], [0], [0], [1], [0, 0, 1, 1], [], []>} : vector<8x4xf32>, vector<4x128xf32>, vector<8x128xf32> -> vector<8x128xf32>
    %c0_3 = arith.constant 0 : index
    %c0_4 = arith.constant 0 : index
    %3 = vector.load %arg3[%c0_3, %c0_4] : memref<1x128xf32, #tpu.memory_space<vmem>>, vector<1x128xf32>
    %4 = vector.broadcast %3 : vector<1x128xf32> to vector<8x128xf32>
    %5 = arith.addf %2, %4 : vector<8x128xf32>
    %6 = math.sin %5 : vector<8x128xf32>
    %c0_5 = arith.constant 0 : index
    %c0_6 = arith.constant 0 : index
    %7 = vector.load %arg4[%c0_5, %c0_6] : memref<1x128xi32, #tpu.memory_space<vmem>>, vector<1x128xi32>
    %c0_i32 = arith.constant 0 : i32
    %8 = vector.broadcast %c0_i32 : i32 to vector<1x128xi32>
    %9 = arith.cmpi ne, %7, %8 : vector<1x128xi32>
    %10 = vector.shape_cast %9 : vector<1x128xi1> to vector<1x128xi1>
    %11 = vector.broadcast %10 : vector<1x128xi1> to vector<8x128xi1>
    %12 = arith.select %11, %5, %6 : vector<8x128xi1>, vector<8x128xf32>
    %c0_7 = arith.constant 0 : index
    %c0_8 = arith.constant 0 : index
    %13 = vector.load %arg5[%c0_7, %c0_8] : memref<8x128xf32, #tpu.memory_space<vmem>>, vector<8x128xf32>
    tpu.vector_store %arg5[%c0_7, %c0_8], %12 {strides = array<i32>} : memref<8x128xf32, #tpu.memory_space<vmem>>, vector<8x128xf32>,
    return
  }
  func.func @transform_0(%arg0: i32) -> (i32, i32) {
    %c0_i32 = arith.constant 0 : i32
    %c0_i32_0 = arith.constant 0 : i32
    return %arg0, %c0_i32 : i32, i32
  }
  func.func @transform_1(%arg0: i32) -> (i32, i32) {
    %c0_i32 = arith.constant 0 : i32
    %c0_i32_0 = arith.constant 0 : i32
    %c0_i32_1 = arith.constant 0 : i32
    return %c0_i32, %c0_i32_0 : i32, i32
  }
  func.func @transform_2(%arg0: i32) -> (i32, i32) {
    %c0_i32 = arith.constant 0 : i32
    %c0_i32_0 = arith.constant 0 : i32
    %c0_i32_1 = arith.constant 0 : i32
    return %c0_i32, %c0_i32_0 : i32, i32
  }
  func.func @transform_3(%arg0: i32) -> (i32, i32) {
    %c0_i32 = arith.constant 0 : i32
    %c0_i32_0 = arith.constant 0 : i32
    %c0_i32_1 = arith.constant 0 : i32
    return %c0_i32, %c0_i32_0 : i32, i32
  }
  func.func @transform_4(%arg0: i32) -> (i32, i32) {
    %c0_i32 = arith.constant 0 : i32
    %c0_i32_0 = arith.constant 0 : i32
    return %arg0, %c0_i32 : i32, i32
  }
}

</mosaic_0001>

<bundles_post_ra>
// kernel: tpu_custom_call.1
= control target key start
LH: loop header
LB: loop body
LE: loop exit
PB: predicated region body
PF: predicated region fallthrough
CT: control target
= control target key end

     0   :  { %vm31_vm0 = vcmask 1043456   ;;  %v287_v2 = vmov 0.0   ;;  %vm288_vm1 = vmmov 0   ;;  %vm27_vm2 = vcmask 31744   ;;  %s359_s0 = inlined_call_operand.vmem [shape: f32[8,4], index: 0, kind: input, shape index: {}]   ;;  %s360_s1 = inlined_call_operand.vmem [shape: f32[4,128], index: 1, kind: input, shape index: {}]   ;;  %s361_s2 = inlined_call_operand.vmem [shape: f32[1,128], index: 2, kind: input, shape index: {}]   ;;  %s362_s3 = inlined_call_operand.vmem [shape: s32[1,128], index: 3, kind: input, shape index: {}]   ;;  %s363_s4 = inlined_call_operand.hbm [shape: f32[8,128], index: 4, kind: output, shape index: {}]  }
   0x1   :  { %v19_v0 = vld [vmem:[%s360_s1] sm:$0xf]  ;;  %242 = vmatprep.subr.mxu0 %v287_v2  ;;  %244 = vmatprep.mubr.msk.f32.mxu0 %vm288_vm1, %v287_v2 }
   0x2   :  { %v18_v1 = vld [vmem:[%s359_s0] sm:$0xff] }
   0x3   :  { %9 = vsyncpa [#allocation3], 0  ;;  %243 = vmatpush3.msk.msra.mxu0 %vm31_vm0, %v19_v0  ;;  %v233_v3 = vld [vmem:[%s361_s2] ss:$0 sm:$0xff]  ;;  %v289_v17 = vmov 683565275  }
   0x4   :  { %245 = vmatmul.mubr.msk.f32.vlgmr.msra.gmra.mxu0 %vm27_vm2, %v18_v1  ;;  %v290_v19 = vmov 2475754826   ;;  %v291_v22 = vmov 2131351028   ;;  %v292_v25 = vmov 2102212464  }
   0x5   :  { %v293_v28 = vmov 920167782   ;;  %v294_v31 = vmov 1326507024   ;;  %s296_s2 = smov [#allocation2]  }
   0x6   :  { %s225_s21 = sshll.u32 %s296_s2, 4  ;;  %s226_s21 = int_to_ptr.vmem [resolvable:$true] %s225_s21 }
   0x7   :  { %p270_p1 = scmp.lt.s32.totalorder %s226_s21, %s226_s21 }
  0xc4   :  { %v101_v4 = vpop.f32.mrf.mxu0 }
  0xc5   :  { %v331_v5 = vadd.f32 %v233_v3, %v101_v4 }
  0xc6   :  { %v246_v6 = vpop.f32.mrf.mxu0 }
  0xc7   :  { %v108_v7 = vand.u32 2139095040, %v331_v5  ;;  %v105_v11 = vand.u32 2147483647, %v331_v5  ;;  %vm107_vm10 = vcmp.lt.s32.totalorder %v331_v5, 0  ;;  %vm197_vm1 = vweird.f32 %v331_v5 }
  0xc9   :  { %v109_v8 = vshrl.u32 %v108_v7, 23  ;;  %v112_v15 = vand.u32 8388607, %v105_v11  ;;  %vm106_vm11 = vcmp.le.f32.partialorder %v105_v11, 0.7853982 }
  0xcb   :  { %v236_v9 = vadd.s32 4294967169, %v109_v8  ;;  %v113_v33 = vor.u32 8388608, %v112_v15 }
  0xcd   :  { %v115_v10 = vadd.s32 1, %v236_v9  ;;  %v153_v47 = vshll.u32 %v113_v33, 8 }
  0xcf   :  { %vm116_vm3 = vcmp.gt.s32.totalorder %v115_v10, 0 }
  0xd0   :  { %v117_v12 = vsel %vm116_vm3, %v115_v10, 0 }
  0xd1   :  { %v119_v13 = vand.u32 31, %v117_v12  ;;  %v118_v16 = vshrl.u32 %v117_v12, 5 }
  0xd3   :  { %v120_v14 = vsub.s32 32, %v119_v13  ;;  %v122_v18 = vshll.u32 %v289_v17, %v119_v13  ;;  %v125_v20 = vshll.u32 %v290_v19, %v119_v13  ;;  %v128_v24 = vshll.u32 %v291_v22, %v119_v13 }
  0xd4   :  { %v131_v27 = vshll.u32 %v292_v25, %v119_v13  ;;  %v134_v30 = vshll.u32 %v293_v28, %v119_v13  ;;  %vm137_vm4 = vcmp.lt.s32.totalorder %v118_v16, 1  ;;  %vm140_vm5 = vcmp.lt.s32.totalorder %v118_v16, 4 }
  0xd5   :  { %v123_v21 = vshrl.u32 %v290_v19, %v120_v14  ;;  %v126_v23 = vshrl.u32 %v291_v22, %v120_v14  ;;  %v129_v26 = vshrl.u32 %v292_v25, %v120_v14  ;;  %v132_v29 = vshrl.u32 %v293_v28, %v120_v14 }
  0xd6   :  { %v135_v32 = vshrl.u32 %v294_v31, %v120_v14  ;;  %v121_v42 = vshrl.u32 %v289_v17, %v120_v14  ;;  %vm139_vm6 = vcmp.lt.s32.totalorder %v118_v16, 3  ;;  %vm138_vm7 = vcmp.lt.s32.totalorder %v118_v16, 2 }
  0xd7   :  { %v124_v34 = vor.u32 %v123_v21, %v122_v18  ;;  %v127_v35 = vor.u32 %v126_v23, %v125_v20  ;;  %v130_v36 = vor.u32 %v129_v26, %v128_v24  ;;  %v133_v37 = vor.u32 %v132_v29, %v131_v27  ;;  %v209_v27 = vld [vmem:[%s362_s3] sm:$0x1]  ;;  %s265_s3 = scalar_lea.vmem %s226_s21, 128 }
  0xd8   :  { %v136_v38 = vor.u32 %v135_v32, %v134_v30  ;;  %v212_v25 = vlaneseq  ;;  %vm210_vm12 = vcmp.ne.s32.totalorder %v209_v27, 0  ;;  %v295_v31 = vmov 0   ;;  %p266_p0 = scmp.ne.s32.totalorder %s226_s21, %s265_s3  ;;  %p271_p2 = scmp.lt.s32.totalorder %s265_s3, %s265_s3 }
  0xd9   :  { %v142_v39 = vsel %vm140_vm5, %v130_v36, 2102212464  ;;  %v145_v40 = vsel %vm137_vm4, %v124_v34, %v127_v35  ;;  %v149_v41 = vsel %vm137_vm4, %v127_v35, %v130_v36  ;;  %v146_v43 = vsel %vm140_vm5, %v133_v37, 920167782 }
  0xda   :  { %v150_v44 = vsel %vm140_vm5, %v136_v38, 1326507024  ;;  %v147_v45 = vsel %vm139_vm6, %v130_v36, %v146_v43  ;;  %v141_v48 = vsel %vm137_vm4, %v121_v42, %v124_v34  ;;  %v143_v49 = vsel %vm139_vm6, %v127_v35, %v142_v39  ;;  %p272_p3 = por %p271_p2, %p270_p1 }
  0xdb   :  { %v151_v46 = vsel %vm139_vm6, %v133_v37, %v150_v44  ;;  %v148_v50 = vsel %vm138_vm7, %v145_v40, %v147_v45  ;;  %v144_v56 = vsel %vm138_vm7, %v141_v48, %v143_v49  ;;  %v213_v28 = vshrl.u32 %v212_v25, 7 }
  0xdc   :  { %v152_v51 = vsel %vm138_vm7, %v149_v41, %v151_v46  ;;  %v340_v54 = vmul.u32.u64.low %v153_v47, %v148_v50  ;;  %v341_v55 = vmul.u32.u64.high %v153_v47, %v148_v50, %v340_v54  ;;  %v160_v58 = vmul.u32 %v153_v47, %v144_v56  ;;  %p273_p4 = pnand %p272_p3, %p266_p0 }
  0xdd   :  { %v337_v52 = vmul.u32.u64.low %v153_v47, %v152_v51  ;;  %v338_v53 = vmul.u32.u64.high %v153_v47, %v152_v51, %v337_v52  ;;  %v214_v30 = vsub.s32 0, %v213_v28  ;;  %v211_v32 = vsel %vm210_vm12, 1, %v295_v31 }
  0xde   :  { %v163_v57 = vadd.s32 1, %v341_v55 }
  0xdf   :  { %vm162_vm8 = vc.u32 %v338_v53, %v340_v54  ;;  %v161_v7 = vadd.s32 %v340_v54, %v338_v53  ;;  %v215_v34 = vrot.slane %v211_v32, %v214_v30 }
  0xe0   :  { %v164_v59 = vsel %vm162_vm8, %v163_v57, %v341_v55 }
  0xe1   :  { %v165_v60 = vadd.s32 %v164_v59, %v160_v58  ;;  %vm216_vm0 = vcmp.eq.s32.totalorder %v215_v34, 1 }
  0xe3   :  { %v166_v61 = vadd.s32 536870912, %v165_v60 }
  0xe5   :  { %v167_v62 = vshrl.u32 %v166_v61, 30 }
  0xe7   :  { %v168_v63 = vshll.u32 %v167_v62, 30  ;;  %v191_v21 = vsub.s32 4, %v167_v62 }
  0xe9   :  { %v169_v0 = vsub.s32 %v165_v60, %v168_v63  ;;  %v192_v24 = vsel %vm107_vm10, %v191_v21, %v167_v62 }
  0xea   :  { %v194_v26 = vsel %vm106_vm11, 0, %v192_v24 }
  0xeb   :  { %v171_v1 = vsub.s32 0, %v169_v0  ;;  %v198_v29 = vadd.s32 3, %v194_v26 }
  0xed   :  { %v237_v2 = vmin.u32 %v171_v1, %v169_v0  ;;  %v199_v33 = vand.u32 3, %v198_v29 }
  0xef   :  { %v173_v3 = vclz %v237_v2  ;;  %vm204_vm13 = vcmp.eq.s32.totalorder %v199_v33, 2  ;;  %vm201_vm14 = vcmp.eq.s32.totalorder %v199_v33, 0  ;;  %vm200_vm15 = vcmp.lt.s32.totalorder %v199_v33, 2 }
  0xf1   :  { %v238_v4 = vadd.s32 4294967294, %v173_v3 }
  0xf3   :  { %vm239_vm9 = vcmp.lt.s32.totalorder %v238_v4, 0 }
  0xf4   :  { %v176_v6 = vsel %vm239_vm9, 0, %v238_v4 }
  0xf5   :  { %v177_v8 = vsub.s32 32, %v176_v6  ;;  %v181_v9 = vsub.s32 4294967266, %v176_v6  ;;  %v178_v10 = vshll.u32 %v169_v0, %v176_v6 }
  0xf7   :  { %v179_v12 = vshrl.u32 %v161_v7, %v177_v8  ;;  %v182_v13 = vadd.s32 127, %v181_v9 }
  0xf9   :  { %v180_v14 = vor.u32 %v179_v12, %v178_v10  ;;  %v183_v15 = vshll.u32 %v182_v13, 23 }
  0xfb   :  { %v184_v16 = vor.u32 4788187, %v183_v15  ;;  %v187_v18 = vcvt.s32.f32 %v180_v14 }
  0xfd   :  { %v185_v17 = vand.u32 2147483647, %v184_v16 }
  0xff   :  { %v188_v19 = vmul.f32 %v187_v18, %v185_v17 }
 0x101   :  { %v189_v20 = vxor.u32 2147483648, %v188_v19 }
 0x103   :  { %v190_v22 = vsel %vm107_vm10, %v189_v20, %v188_v19 }
 0x104   :  { %v193_v23 = vsel %vm106_vm11, %v331_v5, %v190_v22 }
 0x105   :  { %261 = vcosq.f32 %v193_v23 }
 0x106   :  { %263 = vsinq.f32 %v193_v23 }
 0x112   :  { %v262_v11 = vpop.eup %261 }
 0x113   :  { %v264_v35 = vpop.eup %263  ;;  %v205_v36 = vxor.u32 2147483648, %v262_v11 }
 0x114   :  { %v202_v37 = vxor.u32 2147483648, %v264_v35 }
 0x115   :  { %v206_v38 = vsel %vm204_vm13, %v205_v36, %v264_v35 }
 0x116   :  { %v203_v39 = vsel %vm201_vm14, %v262_v11, %v202_v37 }
 0x117   :  { %v207_v40 = vsel %vm200_vm15, %v203_v39, %v206_v38 }
 0x118   :  { %v208_v41 = vsel %vm197_vm1, nan, %v207_v40 }
 0x119   :  { %v217_v42 = vsel %vm216_vm0, %v331_v5, %v208_v41 }
 0x11a   :  { %218 = vst [vmem:[#allocation2] sm:$0xff] %v217_v42 }
 0x11b   :  { %276 = shalt.err (!%p273_p4)
}
 0x11c   :  { %228 = dma.vmem_to_hbm [thread:$0]  %s226_s21, 128, %s363_s4, [#allocation3]  }
 0x11d   :  { %285 = dma.done.wait [#allocation3], 128  }
 0x11e   :  { %286 = vsyncadd [#allocation3], 4294967168 }
 0x11f   :  { %232 = vsyncpa [#allocation3], 1 }

</bundles_post_ra>
